<compile_context>
chip_gen: v5e
topology: v5e:2x2
jax: 0.10.0
libtpu: 0.0.40
codegen_flags: <defaults>
</compile_context>

<pallas_src>
import jax
import jax.numpy as jnp
from jax import lax
from jax.experimental import pallas as pl
from jax.experimental.pallas import tpu as pltpu


# ---------------------------------------------------------------------------
# Kernels
# ---------------------------------------------------------------------------
def _head_epilogue(pooled, w1_ref, b1_ref, w2_ref, b2_ref, pred_ref):
    """Regression head on the pooled (tb, H) f32 activations.
    Dropout layers are identity at inference."""
    z1 = jnp.dot(pooled, w1_ref[...],
                 preferred_element_type=jnp.float32) + b1_ref[...]
    z1 = jnp.maximum(z1, 0.0)                                    # (tb, 64)
    # (1,64) . (tb,64)^T -> (1,tb): lane-dense prediction row, no transpose.
    z2 = lax.dot_general(w2_ref[...], z1,
                         dimension_numbers=(((1,), (1,)), ((), ())),
                         preferred_element_type=jnp.float32)     # (1, tb)
    pred_ref[0] = (z2 + b2_ref[...]).astype(pred_ref.dtype)


def _make_kernel(masked, seq_len):
    if masked:
        def kernel(hs_ref, len_ref, w1_ref, b1_ref, w2_ref, b2_ref,
                   pred_ref, sum_acc, cnt_acc):
            si = pl.program_id(1)
            tb, ts, _ = hs_ref.shape

            @pl.when(si == 0)
            def _init():
                sum_acc[...] = jnp.zeros_like(sum_acc)
                cnt_acc[...] = jnp.zeros_like(cnt_acc)

            hs = hs_ref[...]                                   # (tb, ts, H) native
            # Rebuild the prefix mask from per-example lengths: no (B,S,1)
            # mask stream, no 128-lane padding, no extra HBM traffic.
            pos = lax.broadcasted_iota(jnp.int32, (tb, ts, 1), 1) + si * ts
            keep = pos < len_ref[...]                          # (tb, ts, 1) bool
            sum_acc[...] += jnp.sum(hs * keep.astype(hs.dtype), axis=1,
                                    dtype=jnp.float32)         # (tb, H)
            cnt_acc[...] += jnp.sum(keep.astype(jnp.float32), axis=1)   # (tb, 1)

            @pl.when(si == pl.num_programs(1) - 1)
            def _epilogue():
                pooled = sum_acc[...] / jnp.maximum(cnt_acc[...], 1e-9)
                _head_epilogue(pooled, w1_ref, b1_ref, w2_ref, b2_ref, pred_ref)

        return kernel

    inv_len = 1.0 / float(seq_len)

    def kernel_nomask(hs_ref, w1_ref, b1_ref, w2_ref, b2_ref,
                      pred_ref, sum_acc):
        si = pl.program_id(1)

        @pl.when(si == 0)
        def _init():
            sum_acc[...] = jnp.zeros_like(sum_acc)

        sum_acc[...] += jnp.sum(hs_ref[...], axis=1, dtype=jnp.float32)

        @pl.when(si == pl.num_programs(1) - 1)
        def _epilogue():
            _head_epilogue(sum_acc[...] * inv_len,
                           w1_ref, b1_ref, w2_ref, b2_ref, pred_ref)

    return kernel_nomask


# ---------------------------------------------------------------------------
# Tiling / VMEM sizing
# ---------------------------------------------------------------------------
def _tpu_vmem_capacity():
    cap = 64 << 20                       # conservative default (v7x-sized)
    try:
        info = pltpu.get_tpu_info()
        cap = int(getattr(info, "vmem_capacity_bytes", cap)) or cap
    except Exception:
        pass
    return cap


def _choose_tiles(B, S, H, itemsize, vmem_limit, prefer_batch_split):
    """Pick (tb, ts).  Prefer >=2 batch tiles when prefer_batch_split (v7x has
    2 TensorCores sharing the chip); then pick the largest seq tile whose
    double-buffered hidden block plus its f32 temporaries fits the VMEM
    budget.  Shrinks tb before giving up on ts (graceful for unaligned S)."""
    per_elem = 2 * itemsize + 8                       # 2 DMA buffers + f32 temps
    head_bytes = 2 * (H * 64 * 4) + (512 << 10)       # resident head weights + pads

    bcands = [d for d in range(min(B, 128), 0, -1) if B % d == 0]
    if prefer_batch_split:
        bcands.sort(key=lambda d: (B // d < 2, -d))   # >=2 tiles first, then bigger
    scands = [d for d in range(S, 0, -1) if S % d == 0 and (d % 8 == 0 or d == S)]

    for tb in bcands:
        fixed = head_bytes + tb * H * 4 + tb * (8 * 128 * 4) * 2
        budget = vmem_limit - fixed
        for ts in scands:
            if tb * ts * H * per_elem <= budget:
                return tb, ts
    return min(bcands), scands[-1]                    # nothing fits: smallest legal


# ---------------------------------------------------------------------------
# Wrapper (== SimpleRegressionModel.forward downstream of the base model)
# ---------------------------------------------------------------------------
def simple_regression_forward(hidden_states, w1, b1, w2, b2,
                              attention_mask=None, labels=None,
                              *, tb=None, ts=None):
    """Returns {'loss': ..., 'predictions': ...} matching the module output."""
    B, S, H = hidden_states.shape
    HID = w1.shape[1]
    masked = attention_mask is not None

    vmem_cap = _tpu_vmem_capacity()
    vmem_limit = min(vmem_cap * 3 // 4, 96 << 20)
    prefer_split = vmem_cap <= (64 << 20)     # 64 MiB-class chip => v7x (2 TCs)

    auto_tb, auto_ts = _choose_tiles(B, S, H, hidden_states.dtype.itemsize,
                                     vmem_limit, prefer_split)
    tb = auto_tb if tb is None else tb
    ts = auto_ts if ts is None else ts
    assert B % tb == 0, (B, tb)
    assert S % ts == 0 and (ts % 8 == 0 or ts == S), (S, ts)
    nbt, nst = B // tb, S // ts

    kernel = _make_kernel(masked, S)

    in_specs = [pl.BlockSpec((tb, ts, H), lambda bi, si: (bi, si, 0))]
    inputs = [hidden_states]                           # native dtype, streamed
    scratch = [pltpu.VMEM((tb, H), jnp.float32)]       # masked-sum accumulator

    if masked:
        # TODO(synk): general (non-contiguous) attention masks are approximated
        # by per-example token counts; prefix / right-padding masks are exact.
        lengths = jnp.asarray(attention_mask).astype(jnp.float32).sum(axis=1)
        lengths = lengths.astype(jnp.int32).reshape(B, 1, 1)
        inputs.append(lengths)
        in_specs.append(pl.BlockSpec((tb, 1, 1), lambda bi, si: (bi, 0, 0)))
        scratch.append(pltpu.VMEM((tb, 1), jnp.float32))   # token-count accumulator

    # Head parameters: constant index_map -> fetched once, resident in VMEM.
    in_specs += [
        pl.BlockSpec((H, HID), lambda bi, si: (0, 0)),
        pl.BlockSpec((1, HID), lambda bi, si: (0, 0)),
        pl.BlockSpec((1, HID), lambda bi, si: (0, 0)),
        pl.BlockSpec((1, 1), lambda bi, si: (0, 0)),
    ]
    inputs += [
        w1.astype(jnp.float32),
        b1.reshape(1, HID).astype(jnp.float32),
        w2.reshape(1, HID).astype(jnp.float32),        # row form of Linear(64,1).weight
        b2.reshape(1, 1).astype(jnp.float32),
    ]

    grid_spec = pltpu.PrefetchScalarGridSpec(
        num_scalar_prefetch=0,
        grid=(nbt, nst),
        in_specs=in_specs,
        # lane-dense prediction row per batch tile; block dims == full dims.
        out_specs=pl.BlockSpec((1, 1, tb), lambda bi, si: (bi, 0, 0)),
        scratch_shapes=scratch,
    )

    preds = pl.pallas_call(
        kernel,
        out_shape=jax.ShapeDtypeStruct((nbt, 1, tb), jnp.float32),
        grid_spec=grid_spec,
        compiler_params=pltpu.CompilerParams(
            dimension_semantics=("parallel", "arbitrary"),
            vmem_limit_bytes=vmem_limit,
        ),
    )(*inputs).reshape(B)                              # == predictions.squeeze(-1)

    loss = None
    if labels is not None:
        loss = jnp.mean((preds - labels.astype(jnp.float32)) ** 2)
    return {"loss": loss, "predictions": preds}


# ---------------------------------------------------------------------------
# Pure-JAX reference + self-test
# ---------------------------------------------------------------------------
def _reference(hidden_states, attention_mask, w1, b1, w2, b2, labels=None):
    hs = hidden_states.astype(jnp.float32)
    if attention_mask is not None:
        m = attention_mask.astype(jnp.float32)[:, :, None]
        pooled = jnp.sum(hs * m, axis=1) / jnp.maximum(jnp.sum(m, axis=1), 1e-9)
    else:
        pooled = jnp.mean(hs, axis=1)
    z1 = jnp.maximum(pooled @ w1 + b1, 0.0)
    preds = (z1 @ w2 + b2)[:, 0]
    loss = None if labels is None else jnp.mean((preds - labels) ** 2)
    return loss, preds


if __name__ == "__main__":
    # Small shapes consistent with the forward: B=4, S=32, H=32, head dim 64.
    B, S, H, HID = 4, 32, 32, 64
    key = jax.random.PRNGKey(0)
    k_hs, k_lbl, k_w1, k_b1, k_w2, k_b2 = jax.random.split(key, 6)

    hidden_states = jax.random.normal(k_hs, (B, S, H), dtype=jnp.float32)
    # Prefix (right-padding) attention masks; lengths cross the ts=16 boundary.
    lengths = jnp.array([32, 20, 9, 1], dtype=jnp.int32)
    attention_mask = (jnp.arange(S)[None, :] < lengths[:, None]).astype(jnp.float32)
    labels = jax.random.normal(k_lbl, (B,), dtype=jnp.float32)

    w1 = jax.random.normal(k_w1, (H, HID), dtype=jnp.float32) * 0.05
    b1 = jax.random.normal(k_b1, (HID,), dtype=jnp.float32) * 0.05
    w2 = jax.random.normal(k_w2, (HID, 1), dtype=jnp.float32) * 0.05
    b2 = jax.random.normal(k_b2, (1,), dtype=jnp.float32) * 0.05

    # 1) f32, masked, forced tb=2 / ts=16 so both the batch-tiling and the
    #    seq-accumulator (pl.when init/epilogue) paths are exercised.
    out = simple_regression_forward(hidden_states, w1, b1, w2, b2,
                                    attention_mask=attention_mask,
                                    labels=labels, tb=2, ts=16)
    jax.block_until_ready(out["predictions"])
    ref_loss, ref_preds = _reference(hidden_states, attention_mask,
                                     w1, b1, w2, b2, labels)
    assert jnp.allclose(out["predictions"], ref_preds, atol=1e-4, rtol=1e-4)
    assert jnp.allclose(out["loss"], ref_loss, atol=1e-4, rtol=1e-4)

    # 2) bf16 activations stream in native dtype (auto tiling); f32 accumulate.
    hs16 = hidden_states.astype(jnp.bfloat16)
    out16 = simple_regression_forward(hs16, w1, b1, w2, b2,
                                      attention_mask=attention_mask,
                                      labels=labels)
    jax.block_until_ready(out16["predictions"])
    ref_loss16, ref_preds16 = _reference(hs16, attention_mask,
                                         w1, b1, w2, b2, labels)
    assert jnp.allclose(out16["predictions"], ref_preds16, atol=1e-3, rtol=1e-3)
    assert jnp.allclose(out16["loss"], ref_loss16, atol=1e-3, rtol=1e-3)

    # 3) no-mask fast path: plain mean over the sequence, no mask input at all.
    out_nm = simple_regression_forward(hidden_states, w1, b1, w2, b2)
    jax.block_until_ready(out_nm["predictions"])
    _, ref_preds_nm = _reference(hidden_states, None, w1, b1, w2, b2)
    assert jnp.allclose(out_nm["predictions"], ref_preds_nm, atol=1e-4, rtol=1e-4)
    assert out_nm["loss"] is None

    print("KERNEL_OK")
</pallas_src>

<mosaic_0001>
module attributes {stable_mosaic.version = 11 : i64} {
  func.func @kernel(%arg0: i32, %arg1: i32, %arg2: memref<2x16x32xf32, #tpu.memory_space<vmem>>, %arg3: memref<2x1x1xi32, #tpu.memory_space<vmem>>, %arg4: memref<32x64xf32, #tpu.memory_space<vmem>>, %arg5: memref<1x64xf32, #tpu.memory_space<vmem>>, %arg6: memref<1x64xf32, #tpu.memory_space<vmem>>, %arg7: memref<1x1xf32, #tpu.memory_space<vmem>>, %arg8: memref<1x1x2xf32, #tpu.memory_space<vmem>>, %arg9: memref<2x32xf32, #tpu.memory_space<vmem>>, %arg10: memref<2x1xf32, #tpu.memory_space<vmem>>) attributes {dimension_semantics = [#tpu.dimension_semantics<parallel>, #tpu.dimension_semantics<arbitrary>], iteration_bounds = array<i64: 2, 2>, scalar_prefetch = 0 : i64, scratch_operands = 2 : i64, tpu.core_type = #tpu.core_type<tc>, window_params = [{transform_indices = @transform_0, window_bounds = array<i64: 2, 16, 32>}, {transform_indices = @transform_1, window_bounds = array<i64: 2, 1, 1>}, {pipeline_mode = #tpu.pipeline_mode<synchronous>, transform_indices = @transform_2, window_bounds = array<i64: 32, 64>}, {pipeline_mode = #tpu.pipeline_mode<synchronous>, transform_indices = @transform_3, window_bounds = array<i64: 1, 64>}, {pipeline_mode = #tpu.pipeline_mode<synchronous>, transform_indices = @transform_4, window_bounds = array<i64: 1, 64>}, {pipeline_mode = #tpu.pipeline_mode<synchronous>, transform_indices = @transform_5, window_bounds = array<i64: 1, 1>}, {transform_indices = @transform_6, window_bounds = array<i64: 1, 1, 2>}]} {
    %c0_i32 = arith.constant 0 : i32
    %0 = arith.cmpi eq, %arg1, %c0_i32 : i32
    %1 = arith.extui %0 : i1 to i32
    %c0_i32_0 = arith.constant 0 : i32
    %2 = arith.cmpi ne, %1, %c0_i32_0 : i32
    scf.if %2 {
      %cst_16 = arith.constant 0.000000e+00 : f32
      %28 = vector.broadcast %cst_16 : f32 to vector<2x32xf32>
      %c0_17 = arith.constant 0 : index
      %c0_18 = arith.constant 0 : index
      %29 = vector.load %arg9[%c0_17, %c0_18] : memref<2x32xf32, #tpu.memory_space<vmem>>, vector<2x32xf32>
      tpu.vector_store %arg9[%c0_17, %c0_18], %28 {strides = array<i32>} : memref<2x32xf32, #tpu.memory_space<vmem>>, vector<2x32xf32>,
      %cst_19 = arith.constant 0.000000e+00 : f32
      %30 = vector.broadcast %cst_19 : f32 to vector<2x1xf32>
      %c0_20 = arith.constant 0 : index
      %c0_21 = arith.constant 0 : index
      %31 = vector.load %arg10[%c0_20, %c0_21] : memref<2x1xf32, #tpu.memory_space<vmem>>, vector<2x1xf32>
      tpu.vector_store %arg10[%c0_20, %c0_21], %30 {strides = array<i32>} : memref<2x1xf32, #tpu.memory_space<vmem>>, vector<2x1xf32>,
    } else {
    }
    %c0 = arith.constant 0 : index
    %c0_1 = arith.constant 0 : index
    %c0_2 = arith.constant 0 : index
    %3 = vector.load %arg2[%c0, %c0_1, %c0_2] : memref<2x16x32xf32, #tpu.memory_space<vmem>>, vector<2x16x32xf32>
    %4 = tpu.iota {dimensions = array<i32: 1>} : vector<2x16x1xi32>
    %c16_i32 = arith.constant 16 : i32
    %5 = arith.muli %arg1, %c16_i32 : i32
    %6 = vector.broadcast %5 : i32 to vector<2x16x1xi32>
    %7 = arith.addi %4, %6 : vector<2x16x1xi32>
    %c0_3 = arith.constant 0 : index
    %c0_4 = arith.constant 0 : index
    %c0_5 = arith.constant 0 : index
    %8 = vector.load %arg3[%c0_3, %c0_4, %c0_5] : memref<2x1x1xi32, #tpu.memory_space<vmem>>, vector<2x1x1xi32>
    %9 = vector.broadcast %8 : vector<2x1x1xi32> to vector<2x16x1xi32>
    %10 = arith.cmpi slt, %7, %9 : vector<2x16x1xi32>
    %c0_6 = arith.constant 0 : index
    %c0_7 = arith.constant 0 : index
    %11 = vector.load %arg9[%c0_6, %c0_7] : memref<2x32xf32, #tpu.memory_space<vmem>>, vector<2x32xf32>
    %12 = arith.extui %10 : vector<2x16x1xi1> to vector<2x16x1xi32>
    %13 = arith.sitofp %12 : vector<2x16x1xi32> to vector<2x16x1xf32>
    %14 = vector.broadcast %13 : vector<2x16x1xf32> to vector<2x16x32xf32>
    %15 = arith.mulf %3, %14 : vector<2x16x32xf32>
    %cst = arith.constant dense<0.000000e+00> : vector<2x32xf32>
    %16 = vector.multi_reduction <add>, %15, %cst [1] : vector<2x16x32xf32> to vector<2x32xf32>
    %17 = arith.addf %11, %16 : vector<2x32xf32>
    %c0_8 = arith.constant 0 : index
    %c0_9 = arith.constant 0 : index
    %18 = vector.load %arg9[%c0_8, %c0_9] : memref<2x32xf32, #tpu.memory_space<vmem>>, vector<2x32xf32>
    tpu.vector_store %arg9[%c0_8, %c0_9], %17 {strides = array<i32>} : memref<2x32xf32, #tpu.memory_space<vmem>>, vector<2x32xf32>,
    %c0_10 = arith.constant 0 : index
    %c0_11 = arith.constant 0 : index
    %19 = vector.load %arg10[%c0_10, %c0_11] : memref<2x1xf32, #tpu.memory_space<vmem>>, vector<2x1xf32>
    %20 = arith.extui %10 : vector<2x16x1xi1> to vector<2x16x1xi32>
    %21 = arith.sitofp %20 : vector<2x16x1xi32> to vector<2x16x1xf32>
    %cst_12 = arith.constant dense<0.000000e+00> : vector<2x1xf32>
    %22 = vector.multi_reduction <add>, %21, %cst_12 [1] : vector<2x16x1xf32> to vector<2x1xf32>
    %23 = arith.addf %19, %22 : vector<2x1xf32>
    %c0_13 = arith.constant 0 : index
    %c0_14 = arith.constant 0 : index
    %24 = vector.load %arg10[%c0_13, %c0_14] : memref<2x1xf32, #tpu.memory_space<vmem>>, vector<2x1xf32>
    tpu.vector_store %arg10[%c0_13, %c0_14], %23 {strides = array<i32>} : memref<2x1xf32, #tpu.memory_space<vmem>>, vector<2x1xf32>,
    %c1_i32 = arith.constant 1 : i32
    %25 = arith.cmpi eq, %arg1, %c1_i32 : i32
    %26 = arith.extui %25 : i1 to i32
    %c0_i32_15 = arith.constant 0 : i32
    %27 = arith.cmpi ne, %26, %c0_i32_15 : i32
    scf.if %27 {
      %c0_16 = arith.constant 0 : index
      %c0_17 = arith.constant 0 : index
      %28 = vector.load %arg9[%c0_16, %c0_17] : memref<2x32xf32, #tpu.memory_space<vmem>>, vector<2x32xf32>
      %c0_18 = arith.constant 0 : index
      %c0_19 = arith.constant 0 : index
      %29 = vector.load %arg10[%c0_18, %c0_19] : memref<2x1xf32, #tpu.memory_space<vmem>>, vector<2x1xf32>
      %cst_20 = arith.constant 9.99999971E-10 : f32
      %30 = vector.broadcast %cst_20 : f32 to vector<2x1xf32>
      %31 = arith.maximumf %29, %30 : vector<2x1xf32>
      %32 = vector.broadcast %31 : vector<2x1xf32> to vector<2x32xf32>
      %33 = arith.divf %28, %32 : vector<2x32xf32>
      %c0_21 = arith.constant 0 : index
      %c0_22 = arith.constant 0 : index
      %34 = vector.load %arg4[%c0_21, %c0_22] : memref<32x64xf32, #tpu.memory_space<vmem>>, vector<32x64xf32>
      %cst_23 = arith.constant dense<0.000000e+00> : vector<2x64xf32>
      %35 = tpu.matmul %33, %34, %cst_23 {dimension_numbers = #tpu.dot_dimension_numbers<[1], [0], [0], [1], [0, 0, 1, 1], [], []>} : vector<2x32xf32>, vector<32x64xf32>, vector<2x64xf32> -> vector<2x64xf32>
      %c0_24 = arith.constant 0 : index
      %c0_25 = arith.constant 0 : index
      %36 = vector.load %arg5[%c0_24, %c0_25] : memref<1x64xf32, #tpu.memory_space<vmem>>, vector<1x64xf32>
      %37 = vector.broadcast %36 : vector<1x64xf32> to vector<2x64xf32>
      %38 = arith.addf %35, %37 : vector<2x64xf32>
      %cst_26 = arith.constant 0.000000e+00 : f32
      %39 = vector.broadcast %cst_26 : f32 to vector<2x64xf32>
      %40 = arith.maximumf %38, %39 : vector<2x64xf32>
      %c0_27 = arith.constant 0 : index
      %c0_28 = arith.constant 0 : index
      %41 = vector.load %arg6[%c0_27, %c0_28] : memref<1x64xf32, #tpu.memory_space<vmem>>, vector<1x64xf32>
      %cst_29 = arith.constant dense<0.000000e+00> : vector<1x2xf32>
      %42 = tpu.matmul %41, %40, %cst_29 {dimension_numbers = #tpu.dot_dimension_numbers<[1], [1], [0], [0], [0, 0, 1, 0], [], []>} : vector<1x64xf32>, vector<2x64xf32>, vector<1x2xf32> -> vector<1x2xf32>
      %c0_30 = arith.constant 0 : index
      %c0_31 = arith.constant 0 : index
      %43 = vector.load %arg7[%c0_30, %c0_31] : memref<1x1xf32, #tpu.memory_space<vmem>>, vector<1x1xf32>
      %44 = vector.broadcast %43 : vector<1x1xf32> to vector<1x2xf32>
      %45 = arith.addf %42, %44 : vector<1x2xf32>
      %c0_32 = arith.constant 0 : index
      %c0_33 = arith.constant 0 : index
      %c0_34 = arith.constant 0 : index
      %46 = vector.load %arg8[%c0_32, %c0_33, %c0_34] : memref<1x1x2xf32, #tpu.memory_space<vmem>>, vector<1x1x2xf32>
      %47 = vector.shape_cast %46 : vector<1x1x2xf32> to vector<1x2xf32>
      %48 = vector.shape_cast %45 : vector<1x2xf32> to vector<1x1x2xf32>
      tpu.vector_store %arg8[%c0_32, %c0_33, %c0_34], %48 {strides = array<i32>} : memref<1x1x2xf32, #tpu.memory_space<vmem>>, vector<1x1x2xf32>,
    } else {
    }
    return
  }
  func.func @transform_0(%arg0: i32, %arg1: i32) -> (i32, i32, i32) {
    %c0_i32 = arith.constant 0 : i32
    %c0_i32_0 = arith.constant 0 : i32
    return %arg0, %arg1, %c0_i32 : i32, i32, i32
  }
  func.func @transform_1(%arg0: i32, %arg1: i32) -> (i32, i32, i32) {
    %c0_i32 = arith.constant 0 : i32
    %c0_i32_0 = arith.constant 0 : i32
    %c0_i32_1 = arith.constant 0 : i32
    return %arg0, %c0_i32, %c0_i32_0 : i32, i32, i32
  }
  func.func @transform_2(%arg0: i32, %arg1: i32) -> (i32, i32) {
    %c0_i32 = arith.constant 0 : i32
    %c0_i32_0 = arith.constant 0 : i32
    %c0_i32_1 = arith.constant 0 : i32
    return %c0_i32, %c0_i32_0 : i32, i32
  }
  func.func @transform_3(%arg0: i32, %arg1: i32) -> (i32, i32) {
    %c0_i32 = arith.constant 0 : i32
    %c0_i32_0 = arith.constant 0 : i32
    %c0_i32_1 = arith.constant 0 : i32
    return %c0_i32, %c0_i32_0 : i32, i32
  }
  func.func @transform_4(%arg0: i32, %arg1: i32) -> (i32, i32) {
    %c0_i32 = arith.constant 0 : i32
    %c0_i32_0 = arith.constant 0 : i32
    %c0_i32_1 = arith.constant 0 : i32
    return %c0_i32, %c0_i32_0 : i32, i32
  }
  func.func @transform_5(%arg0: i32, %arg1: i32) -> (i32, i32) {
    %c0_i32 = arith.constant 0 : i32
    %c0_i32_0 = arith.constant 0 : i32
    %c0_i32_1 = arith.constant 0 : i32
    return %c0_i32, %c0_i32_0 : i32, i32
  }
  func.func @transform_6(%arg0: i32, %arg1: i32) -> (i32, i32, i32) {
    %c0_i32 = arith.constant 0 : i32
    %c0_i32_0 = arith.constant 0 : i32
    %c0_i32_1 = arith.constant 0 : i32
    return %arg0, %c0_i32, %c0_i32_0 : i32, i32, i32
  }
}

</mosaic_0001>

<bundles_post_ra>
// kernel: tpu_custom_call.1
= control target key start
LH: loop header
LB: loop body
LE: loop exit
PB: predicated region body
PF: predicated region fallthrough
CT: control target
= control target key end

     0   :  { %s1294_s0 = inlined_call_operand.hbm [shape: f32[4,32,32], index: 0, kind: input, shape index: {}]   ;;  %s1295_s1 = inlined_call_operand.vmem [shape: s32[4,1,1], index: 1, kind: input, shape index: {}]   ;;  %s1296_s2 = inlined_call_operand.hbm [shape: f32[32,64], index: 2, kind: input, shape index: {}]   ;;  %s1297_s3 = inlined_call_operand.vmem [shape: f32[1,64], index: 3, kind: input, shape index: {}]   ;;  %s1298_s4 = inlined_call_operand.vmem [shape: f32[1,64], index: 4, kind: input, shape index: {}]   ;;  %s1299_s5 = inlined_call_operand.<no memory space> [shape: f32[1,1], index: 5, kind: input, shape index: {}]   ;;  %s1300_s6 = inlined_call_operand.hbm [shape: f32[2,1,2], index: 6, kind: output, shape index: {}]  }
   0x1   :  { %1308 = sst [smem:[#allocation26_spill]] %s1296_s2  ;;  %v11_v0 = vstv %s1299_s5 }
   0x2   :  { %12 = vst [vmem:[#allocation4] sm:$0x1] %v11_v0 }
   0x3   :  { %13 = vsyncpa [#allocation6], 0 }
   0x4   :  { %15 = vsyncpa [#allocation6 + $0x1], 0 }
   0x5   :  { %16 = vsyncpa [#allocation9], 0 }
   0x6   :  { %17 = vsyncpa [#allocation7], 0 }
   0x7   :  { %19 = vsyncpa [#allocation7 + $0x1], 0  ;;  %s1057_s23 = smov 0   ;;  %s1059_s24 = smov 0  }
   0x8   :  { %s1061_s25 = smov 0   ;;  %s1063_s26 = smov 0  }
   0x9   :  { %s1065_s27 = smov 0   ;;  %s1067_s28 = smov 0  }
   0xa   :  { %s1069_s29 = smov 0   ;;  %s1071_s5 = smov 0  }
   0xb   :  { %s1073_s30 = smov 0   ;;  %s1075_s7 = smov 0  }
   0xc   :  { %s1077_s8 = smov 0  }
   0xd LB: > { %1309 = sst [smem:[#allocation17_spill]] %s972_s25  ;;  %s675_s9 = sadd.s32 4294967295, %s1004_s8   ;;  %s1004_s8 = sphi %s1077_s8, %s25_s8   ;;  %s1000_s7 = sphi %s1075_s7, %s1333_s7   ;;  %s996_s30 = sphi %s1073_s30, %s1332_s30   ;;  %s992_s5 = sphi %s1071_s5, %s1331_s5   ;;  %s988_s29 = sphi %s1069_s29, %s1330_s29   ;;  %s984_s28 = sphi %s1067_s28, %s1329_s28   ;;  %s980_s27 = sphi %s1065_s27, %s1337_s27   ;;  %s976_s26 = sphi %s1063_s26, %s1336_s26   ;;  %s972_s25 = sphi %s1061_s25, %s1327_s25   ;;  %s968_s24 = sphi %s1059_s24, %s1335_s24   ;;  %s964_s23 = sphi %s1057_s23, %s1334_s23  }
   0xe   : > { %1310 = sst [smem:[#allocation18_spill]] %s984_s28  ;;  %s676_s10 = sadd.s32 4294967294, %s1004_s8  }
   0xf   : > { %1311 = sst [smem:[#allocation19_spill]] %s996_s30  ;;  %s34_s11 = sadd.s32 1, %s996_s30 }
  0x10   : > { %1312 = sst [smem:[#allocation20_spill]] %s1000_s7  ;;  %s37_s12 = sadd.s32 1, %s1000_s7 }
  0x11   : > { %p35_p0 = scmp.ge.s32.totalorder %s34_s11, 2  ;;  %s46_s13 = sadd.s32 1, %s984_s28 }
  0x12   : > { %p53_p1 = scmp.ne.s32.totalorder %s984_s28, %s980_s27  ;;  %p54_p2 = scmp.eq.s32.totalorder %s1004_s8, 0 }
  0x13   : > { %s1339_s11 = smov (%p35_p0, %s34_s11), 0  ;;  %s1341_s12 = smov (!%p35_p0, %s37_s12), %s1000_s7 }
  0x14   : > { %1313 = sst [smem:[#allocation21_spill]] %s1339_s11  ;;  %s42_s14 = ssub.s32 %s996_s30, %s1339_s11 }
  0x15   : > { %p1123_p3 = por %p54_p2, %p53_p1  ;;  %p39_p4 = scmp.ge.s32.totalorder %s1341_s12, 2 }
  0x16   : > { %p59_p5 = scmp.ne.s32.totalorder %s980_s27, %s976_s26  ;;  %p1128_p6 = scmp.eq.s32.totalorder %s675_s9, 0 }
  0x17   : > { %s182_s17 = sadd.s32 1, %s972_s25  ;;  %s1343_s12 = smov (%p39_p4, %s1341_s12), 0 }
  0x18   : > { %1316 = sst [smem:[#allocation22_spill]] %s1343_s12  ;;  %p1137_p7 = por %p1128_p6, %p59_p5 }
  0x19   : > { %p192_p8 = scmp.ne.s32.totalorder %s972_s25, %s968_s24  ;;  %s41_s19 = ssub.s32 %s1000_s7, %s1343_s12 }
  0x1a   : > { %p193_p9 = scmp.eq.s32.totalorder %s675_s9, 3  ;;  %s43_s20 = sor.u32 %s42_s14, %s41_s19 }
  0x1b   : > { %p180_p10 = scmp.eq.s32.totalorder %s41_s19, 0  ;;  %p44_p11 = scmp.eq.s32.totalorder %s43_s20, 0 }
  0x1c   : > { %p1145_p12 = por %p193_p9, %p192_p8  ;;  %p198_p13 = scmp.ne.s32.totalorder %s968_s24, %s964_s23 }
  0x1d   : > { %s1150_s22 = scalar_select %p180_p10, %s972_s25, %s182_s17  }
  0x1e   : > { %s1153_s26 = scalar_select %p44_p11, %s984_s28, %s46_s13  }
  0x1f   : > { %1319 = sst [smem:[#allocation23_spill]] %s1150_s22  ;;  %p199_p0 = scmp.eq.s32.totalorder %s676_s10, 3 }
  0x20   : > { %1320 = sst [smem:[#allocation24_spill]] %s1153_s26  ;;  %p677_p1 = scmp.ge.s32.totalorder %s1004_s8, 1 }
  0x21   : > { %p206_p2 = scmp.lt.s32.totalorder %s1004_s8, 5  ;;  %p1159_p4 = por %p199_p0, %p198_p13 }
  0x22   : > { %s1324_s2 = sld [smem:[#allocation26_spill]]  ;;  %s1006_s13 = smov [#allocation8]  }
  0x23   : > { %s1321_s11 = scalar_select %p1159_p4, 1, 0 }
  0x24   : > { %p1163_p5 = pnand %p677_p1, %p206_p2  ;;  %s219_s10 = sshll.u32 %s1006_s13, 4  ;;  %s220_s10 = int_to_ptr.vmem [resolvable:$true] %s219_s10 }
  0x25   : > { %1322 = sst [smem:[#allocation25_spill]] %s1321_s11  ;;  %s1007_s20 = smov 128  }
  0x26   : > { %p719_p8 = pneg %p1163_p5  ;;  %s1008_s12 = smov 8  }
  0x27   : > { %p679_p10 = scmp.ge.s32.totalorder %s1004_s8, 4 }
  0x28   : > { %s217_s17 = sshll.u32 %s1324_s2, 4  ;;  %p720_p9 = pnand %p719_p8, %p1128_p6  ;;  %s218_s17 = int_to_ptr.hbm [resolvable:$true] %s217_s17 }
  0x29   : > { %238 = sbr.rel (%p679_p10) target bundleno = 62 (0x3e), region = 32 }
  0x2a   : > { %722 = dma.hbm_to_vmem [thread:$0]  (!%p720_p9), %s218_s17, 512, %s220_s10, [#allocation9], %s1007_s20, %s1007_s20, %s1008_s12  }
  0x2e   : > { %s242_s14 = sand.u32 1, %s984_s28   ;;  %s682_s19 = sshll.u32 %s996_s30, 1 }
  0x2f   : > { %s680_s2 = sshll.u32 %s242_s14, 5  ;;  %s703_s13 = sshll.u32 %s1000_s7, 3 }
  0x30   : > { %s252_s26 = sadd.s32 %s703_s13, %s682_s19  ;;  %s246_s25 = scalar_lea.vmem [#allocation5], %s680_s2 }
  0x31   : > { %s684_s22 = sshll.u32 %s252_s26, 3  ;;  %s269_s12 = sshll.u32 %s246_s25, 4  ;;  %s270_s12 = int_to_ptr.vmem [resolvable:$true] %s269_s12 }
  0x32   : > { %s254_s20 = scalar_lea.hbm %s1294_s0, %s684_s22  ;;  %s1009_s28 = smov 512  }
  0x33   : > { %s706_s11 = scalar_select %p1123_p3, [#allocation0], [#allocation13] }
  0x34   : > { %707 = sst [smem:[#allocation12]] (%p1123_p3), %s1009_s28  ;;  %s267_s7 = sshll.u32 %s254_s20, 4  ;;  %s268_s7 = int_to_ptr.hbm [resolvable:$true] %s267_s7 }
  0x35   : > { %s259_s30 = sld [smem:[%s706_s11]]   ;;  %s1010_s19 = smov 256  }
  0x36   : > { %708 = sst [smem:[#allocation12 + $0x1]] (%p1123_p3), %s1010_s19  ;;  %s1011_s2 = smov 2  }
  0x37   : > { %709 = sst [smem:[#allocation12 + $0x2]] (%p1123_p3), %s1011_s2  ;;  %s1012_s25 = smov 128  }
  0x38   : > { %710 = sst [smem:[#allocation12 + $0x3]] (%p1123_p3), %s1012_s25  ;;  %s1013_s26 = smov 8  }
  0x39   : > { %711 = sst [smem:[#allocation12 + $0x4]] (%p1123_p3), %s1012_s25  ;;  %s243_s11 = scalar_lea.sflag [#allocation6], %s242_s14 }
  0x3a   : > { %712 = sst [smem:[#allocation12 + $0x5]] (%p1123_p3), %s1013_s26  ;;  %s1014_s13 = smov [#allocation11]  }
  0x3b   : > { %s685_s22 = sshll.u32 %s259_s30, 26 }
  0x3c   : > { %s686_s28 = sadd.s32 134217728, %s685_s22 }
  0x3d   : > { %713 = dma.general (%p1123_p3), %s268_s7, 512, %s270_s12, %s243_s11, %s1014_s13, [#allocation12], %s686_s28, 0  }
  0x3e PF: > { %302 = sbr.rel (%p1163_p5) target bundleno = 653 (0x28d), region = 44  ;;  %s304_s17 = sand.u32 (!%p1163_p5), 1, %s980_s27  }
  0x3f   : > { %s688_s10 = sshll.u32 (!%p1163_p5), %s304_s17, 5  ;;  %s305_s20 = scalar_lea.sflag (!%p1163_p5), [#allocation6], %s304_s17 }
  0x40   : > { %s1200_s19 = scalar_lea.vmem (!%p1163_p5), [#allocation5], %s688_s10 }
  0x43   : > { %951 = dma.done.wait (%p1137_p7), %s305_s20, 512  }
  0x44   : > { %953 = vsyncadd (%p1137_p7), %s305_s20, 4294966784 }
  0x45   : > { %955 = dma.done.wait (%p1128_p6), [#allocation9], 512  }
  0x46   : > { %957 = vsyncadd (%p1128_p6), [#allocation9], 4294966784  ;;  %s344_s30 = sand.u32 1, %s968_s24   ;;  %s690_s7 = sshll.u32 %s992_s5, 1 }
  0x47   : > { %p349_p3 = scmp.lt.s32.totalorder %s690_s7, 3  ;;  %s1217_s18 = scalar_lea.vmem [#allocation10], %s344_s30 }
  0x48   : > { %p691_p7 = scmp.ne.s32.totalorder %s988_s29, 0 }
  0x49   : > { %s1345_s7 = smov (!%p349_p3, %s690_s7), 3 }
  0x4a   : > { %s351_s14 = scalar_lea.vmem %s1295_s1, %s1345_s7  ;;  %356 = sbr.rel (%p691_p7) target bundleno = 82 (0x52), region = 56 }
  0x4f   : > { %vm357_vm0 = vcmask 254976   ;;  %vm359_vm1 = vcmask 1024   ;;  %v1015_v1 = vmov 0.0  }
  0x50   : > { %358 = vst.msk [vmem:[#allocation2] sm:$0x3] %vm357_vm0, %v1015_v1 }
  0x51   : > { %360 = vst.msk [vmem:[#allocation3] sm:$0x3] %vm359_vm1, %v1015_v1 }
  0x52 PF: > { %v365_v2 = vlaneseq  ;;  %s692_s16 = sshll.u32 %s988_s29, 4  ;;  %v1016_v3 = vmov 0   ;;  %v842_v6 = vld [vmem:[%s351_s14] ss:$0 sm:$0xff]  ;;  %v843_v7 = vld [vmem:[%s351_s14 + $0x1] ss:$0 sm:$0xff] }
  0x53   : > { %831 = vset.pattern.permute.xlu0 %v1016_v3  ;;  %v369_v4 = vstv %s692_s16  ;;  %vm441_vm2 = vcmask 7168   ;;  %v1017_v11 = vmov 0.0   ;;  %vm434_vm7 = vcmask 1041409   ;;  %v361_v40 = vld [vmem:[%s1200_s19] sm:$0xff]  ;;  %v362_v41 = vld [vmem:[%s1200_s19 + $0x8] sm:$0xff]  ;;  %v363_v51 = vld [vmem:[%s1200_s19 + $0x10] sm:$0xff] }
  0x54   : > { %v366_v5 = vshrl.u32 %v365_v2, 7  ;;  %vm465_vm8 = vcmask 1024   ;;  %vm413_vm9 = vcmask 261120   ;;  %v364_v52 = vld [vmem:[%s1200_s19 + $0x18] sm:$0xff]  ;;  %vm438_vm10 = vcmask 254976   ;;  %p697_p6 = scmp.ne.s32.totalorder %s988_s29, 1 }
  0x56   : > { %v367_v8 = vadd.s32 8, %v366_v5  ;;  %v370_v9 = vadd.s32 %v369_v4, %v366_v5 }
  0x58   : > { %v371_v10 = vadd.s32 %v369_v4, %v367_v8  ;;  %vm376_vm3 = vcmp.lt.s32.totalorder %v370_v9, %v842_v6  ;;  %vm378_vm4 = vcmp.lt.s32.totalorder %v370_v9, %v843_v7  ;;  %v440_v35 = vld [vmem:[#allocation3] sm:$0x3] }
  0x59   : > { %v693_v12 = vsel %vm376_vm3, 1.0, %v1017_v11  ;;  %v695_v13 = vsel %vm378_vm4, 1.0, %v1017_v11 }
  0x5a   : > { %vm377_vm5 = vcmp.lt.s32.totalorder %v371_v10, %v842_v6  ;;  %v442_v14 = vsel %vm441_vm2, %v693_v12, 0.0  ;;  %vm379_vm6 = vcmp.lt.s32.totalorder %v371_v10, %v843_v7  ;;  %v451_v15 = vsel %vm441_vm2, %v695_v13, 0.0  ;;  %v380_v6 = vld [vmem:[#allocation2] sm:$0x3] }
  0x5b   : > { %v694_v16 = vsel %vm377_vm5, 1.0, %v1017_v11  ;;  %v696_v17 = vsel %vm379_vm6, 1.0, %v1017_v11 }
  0x5c   : > { %v832_v18 = vpack.i.bf16 %v694_v16, %v693_v12  ;;  %v443_v19 = vsel %vm441_vm2, %v694_v16, 0.0  ;;  %v452_v20 = vsel %vm441_vm2, %v696_v17, 0.0  ;;  %v837_v27 = vpack.i.bf16 %v696_v17, %v695_v13 }
  0x5d   : > { %v444_v21 = vadd.f32 %v443_v19, %v442_v14  ;;  %v453_v22 = vadd.f32 %v452_v20, %v451_v15 }
  0x5e   : > { %833 = vperm.xlu0 %831, %v832_v18  }
  0x5f   : > { %v445_v23 = vrot.slane %v444_v21, 4  ;;  %v454_v24 = vrot.slane %v453_v22, 4 }
  0x61   : > { %v446_v25 = vadd.f32 %v445_v23, %v444_v21  ;;  %v455_v26 = vadd.f32 %v454_v24, %v453_v22 }
  0x63   : > { %v447_v28 = vrot.slane %v446_v25, 2  ;;  %v456_v29 = vrot.slane %v455_v26, 2 }
  0x65   : > { %v448_v30 = vadd.f32 %v447_v28, %v446_v25  ;;  %v457_v31 = vadd.f32 %v456_v29, %v455_v26 }
  0x66   : > { %838 = vperm.xlu0 %831, %v837_v27  }
  0x67   : > { %v449_v32 = vrot.slane %v448_v30, 1  ;;  %v458_v33 = vrot.slane %v457_v31, 1 }
  0x69   : > { %v450_v34 = vadd.f32 %v449_v32, %v448_v30  ;;  %v459_v36 = vadd.f32 %v458_v33, %v457_v31 }
  0x6b   : > { %v462_v37 = vsel %vm434_vm7, %v459_v36, %v450_v34 }
  0x6c   : > { %v464_v38 = vadd.f32 %v462_v37, %v440_v35 }
  0x6e   : > { %466 = vst.msk [vmem:[#allocation3] sm:$0x3] %vm465_vm8, %v464_v38 }
  0xd0   : > { %v834_v39 = vpop.permute.xlu0 %833 }
  0xd1   : > { %v836_v42 = vunpack.i.h.bf16 %v834_v39  ;;  %v835_v43 = vunpack.i.l.bf16 %v834_v39 }
  0xd3   : > { %v409_v44 = vmul.f32 %v835_v43, %v361_v40  ;;  %v410_v45 = vmul.f32 %v836_v42, %v362_v41 }
  0xd5   : > { %v414_v46 = vsel %vm413_vm9, %v409_v44, 0.0  ;;  %v415_v47 = vsel %vm413_vm9, %v410_v45, 0.0 }
  0xd6   : > { %v416_v48 = vadd.f32 %v415_v47, %v414_v46 }
  0xd8   : > { %v417_v49 = vrot.slane %v416_v48, 4  ;;  %v839_v50 = vpop.permute.xlu0 %838 }
  0xd9   : > { %v841_v53 = vunpack.i.h.bf16 %v839_v50  ;;  %v840_v54 = vunpack.i.l.bf16 %v839_v50 }
  0xda   : > { %v418_v55 = vadd.f32 %v417_v49, %v416_v48 }
  0xdb   : > { %v411_v56 = vmul.f32 %v840_v54, %v363_v51  ;;  %v412_v57 = vmul.f32 %v841_v53, %v364_v52 }
  0xdc   : > { %v419_v60 = vrot.slane %v418_v55, 2 }
  0xdd   : > { %v423_v58 = vsel %vm413_vm9, %v411_v56, 0.0  ;;  %v424_v59 = vsel %vm413_vm9, %v412_v57, 0.0 }
  0xde   : > { %v425_v61 = vadd.f32 %v424_v59, %v423_v58  ;;  %v420_v63 = vadd.f32 %v419_v60, %v418_v55 }
  0xe0   : > { %v426_v62 = vrot.slane %v425_v61, 4  ;;  %v421_v2 = vrot.slane %v420_v63, 1 }
  0xe2   : > { %v427_v0 = vadd.f32 %v426_v62, %v425_v61  ;;  %v422_v5 = vadd.f32 %v421_v2, %v420_v63 }
  0xe4   : > { %v428_v1 = vrot.slane %v427_v0, 2 }
  0xe6   : > { %v429_v3 = vadd.f32 %v428_v1, %v427_v0 }
  0xe8   : > { %v430_v4 = vrot.slane %v429_v3, 1 }
  0xea   : > { %v431_v7 = vadd.f32 %v430_v4, %v429_v3 }
  0xeb   : > { %470 = sbr.rel (%p697_p6) target bundleno = 639 (0x27f), region = 60 }
  0xec   : > { %v435_v8 = vsel %vm434_vm7, %v431_v7, %v422_v5 }
  0xed   : > { %v437_v9 = vadd.f32 %v435_v8, %v380_v6 }
  0xef   : > { %439 = vst.msk [vmem:[#allocation2] sm:$0x3] %vm438_vm10, %v437_v9 }
  0xf0   : > { %v472_v10 = vld [vmem:[#allocation3] sm:$0x3]  ;;  %v1018_v11 = vmov 0   ;;  %v527_v13 = vld [vmem:[#allocation4] sm:$0x1]  ;;  %v496_v15 = vld [vmem:[#allocation8 + $0x10] sm:$0xff] }
  0xf1   : > { %844 = vset.pattern.permute.xlu0 %v1018_v11  ;;  %v473_v12 = vmax.f32 %v472_v10, 1e-09  ;;  %v497_v14 = vld [vmem:[#allocation8 + $0x18] sm:$0xff]  ;;  %v495_v16 = vld [vmem:[#allocation8 + $0x8] sm:$0xff]  ;;  %v494_v17 = vld [vmem:[#allocation8] sm:$0xff]  ;;  %vm534_vm15 = vcmask 523264  }
  0xf2   : > { %517 = vmatpush.msra.mxu0 %v497_v14  ;;  %v845_v31 = vld [vmem:[%s1297_s3] ss:$0 sm:$0xff]  ;;  %vm561_vm0 = vcmask 8192  }
  0xf3   : > { %476 = vperm.xlu0 %844, %v473_v12   ;;  %v526_v35 = vld [vmem:[%s1298_s4] sm:$0x1] }
  0xf4   : > { %518 = vmatpush.msra.mxu0 %v496_v15 }
  0xf6   : > { %519 = vmatpush.msra.mxu0 %v495_v16  ;;  %v471_v26 = vld [vmem:[#allocation2] sm:$0x3] }
  0xf8   : > { %520 = vmatpush.msra.mxu0 %v494_v17 }
  0xfb   : > { %530 = vperm.xlu0 %844, %v527_v13  }
 0x165   : > { %v477_v18 = vpop.permute.xlu0 %476 }
 0x166   : > { %846 = vrcp.f32 %v477_v18  ;;  %v490_v22 = vand.u32 2147483648, %v477_v18  ;;  %v488_v24 = vand.u32 2147483647, %v477_v18  ;;  %vm484_vm12 = vweird.f32 %v477_v18 }
 0x168   : > { %v491_v27 = vor.u32 1.1754944e-38, %v490_v22  ;;  %vm489_vm14 = vcmp.eq.f32.partialorder %v488_v24, 8.507059e+37 }
 0x16c   : > { %v847_v19 = vpop.eup %846 }
 0x16d   : > { %v480_v20 = vmul.f32 %v847_v19, %v477_v18  ;;  %vm485_vm11 = vweird.f32 %v847_v19  ;;  %v531_v36 = vpop.permute.xlu0 %530 }
 0x16e   : > { %vm486_vm13 = vmor %vm484_vm12, %vm485_vm11  ;;  %v533_v37 = vperm.slane %v531_v36, 0 }
 0x16f   : > { %v481_v21 = vsub.f32 1.0, %v480_v20 }
 0x171   : > { %v482_v23 = vmul.f32 %v847_v19, %v481_v21 }
 0x173   : > { %v483_v25 = vadd.f32 %v847_v19, %v482_v23 }
 0x175   : > { %v487_v28 = vsel %vm486_vm13, %v847_v19, %v483_v25 }
 0x176   : > { %v492_v29 = vsel %vm489_vm14, %v491_v27, %v487_v28 }
 0x177   : > { %v493_v30 = vmul.f32 %v492_v29, %v471_v26 }
 0x179   : > { %698 = vmatmul.msk.f32.vlgmr.msra.gmra.mxu0 %vm413_vm9, %v493_v30 }
 0x1f6   : > { %v522_v32 = vpop.f32.mrf.mxu0 }
 0x1f7   : > { %v523_v33 = vadd.f32 %v845_v31, %v522_v32 }
 0x1f9   : > { %v525_v34 = vmax.f32 %v523_v33, 0.0 }
 0x1fb   : > { %699 = vmatpush.xpose.msk.msra.mxu1 %vm534_vm15, %v525_v34 }
 0x1fe   : > { %700 = vmatmul.msk.f32.vlgmr.msra.gmra.mxu1 %vm534_vm15, %v526_v35 }
 0x27b   : > { %v558_v38 = vpop.f32.mrf.mxu1 }
 0x27c   : > { %v559_v39 = vadd.f32 %v558_v38, %v533_v37 }
 0x27e   : > { %562 = vst.msk [vmem:[%s1217_s18] sm:$0x1] %vm561_vm0, %v559_v39 }
 0x27f PF: > { %s572_s28 = scalar_lea.hbm %s1300_s6, %s992_s5  ;;  %s574_s11 = sshll.u32 %s1217_s18, 4  ;;  %s575_s11 = int_to_ptr.vmem [resolvable:$true] %s574_s11 }
 0x280   : > { %s576_s13 = sshll.u32 %s572_s28, 4  ;;  %s564_s17 = scalar_lea.sflag [#allocation7], %s344_s30  ;;  %s577_s13 = int_to_ptr.hbm [resolvable:$true] %s576_s13 }
 0x281   : > { %s892_s10 = sshra.s32 %s577_s13, 4  ;;  %s898_s15 = scalar_lea.hbm %s1300_s6, 2  ;;  %s893_s10 = int_to_ptr.hbm [resolvable:$true] %s892_s10 }
 0x282   : > { %s894_s20 = scalar_lea.hbm %s893_s10, 1  ;;  %p899_p1 = scmp.lt.s32.totalorder %s893_s10, %s1300_s6 }
 0x283   : > { %p895_p11 = scmp.ne.s32.totalorder %s893_s10, %s894_s20  ;;  %p900_p2 = scmp.lt.s32.totalorder %s898_s15, %s894_s20 }
 0x285   : > { %p896_p13 = pnand %p895_p11, %p1145_p12  ;;  %p901_p5 = por %p900_p2, %p899_p1 }
 0x287   : > { %p897_p0 = pneg %p896_p13 }
 0x289   : > { %p902_p8 = pnand %p901_p5, %p897_p0 }
 0x28b   : > { %905 = shalt.err (!%p902_p8)
}
 0x28c   : > { %717 = dma.vmem_to_hbm [thread:$0]  (%p1145_p12), %s575_s11, 16, %s577_s13, %s564_s17  }
 0x28d PF: > { %p729_p9 = scmp.ge.s32.totalorder %s1004_s8, 2  ;;  %s588_s30 = sand.u32 1, %s964_s23  }
 0x28e   : > { %s589_s18 = scalar_lea.sflag [#allocation7], %s588_s30 }
 0x28f   : > { %p724_p10 = pnand %p729_p9, %p1159_p4 }
 0x291   : > { %p725_p3 = pneg %p724_p10 }
 0x293   : > { %959 = dma.done.wait (%p725_p3), %s589_s18, 16  }
 0x294   : > { %961 = vsyncadd (%p725_p3), %s589_s18, 4294967280  ;;  %s25_s8 = sadd.s32 1, %s1004_s8   ;;  %s1326_s16 = sld [smem:[#allocation17_spill]] }
 0x295   : > { %p22_p7 = scmp.ge.s32.totalorder %s25_s8, 6   ;;  %s1327_s25 = sld [smem:[#allocation23_spill]] }
 0x296   : > { %s1328_s21 = sld [smem:[#allocation18_spill]]  ;;  %s1334_s23 = smov %s968_s24 }
 0x297   : > { %s1329_s28 = sld [smem:[#allocation24_spill]]  ;;  %s1336_s26 = smov %s980_s27 }
 0x298   : > { %s1330_s29 = sld [smem:[#allocation19_spill]]  ;;  %24 = sbr.rel (!%p22_p7) target bundleno = 13 (0xd), region = 109 }
 0x299   : > { %s1331_s5 = sld [smem:[#allocation20_spill]] }
 0x29a   : > { %s1332_s30 = sld [smem:[#allocation21_spill]]  ;;  %s1335_s24 = smov %s1326_s16 }
 0x29b   : > { %s1333_s7 = sld [smem:[#allocation22_spill]] }
 0x29c   : > { %s1337_s27 = smov %s1328_s21 }
 0x29d   :  { %594 = vsyncpa [#allocation6], 1 }
 0x29e   :  { %596 = vsyncpa [#allocation6 + $0x1], 1 }
 0x29f   :  { %597 = vsyncpa [#allocation9], 1 }
 0x2a0   :  { %598 = vsyncpa [#allocation7], 1 }
 0x2a1   :  { %600 = vsyncpa [#allocation7 + $0x1], 1 }

</bundles_post_ra>
